<compile_context>
chip_gen: v6e
topology: v6e:2x2x1
jax: 0.10.0
libtpu: 0.0.40
codegen_flags: <defaults>
</compile_context>

<pallas_src>
import functools

import jax
import jax.numpy as jnp
from jax import lax
from jax.experimental import pallas as pl
from jax.experimental.pallas import tpu as pltpu


def _round_up(x, m):
    return (x + m - 1) // m * m


def _vmem_budget_bytes():
    """~75% of physical per-core VMEM; conservative (v7x) fallback."""
    phys = 64 << 20
    try:
        info = pltpu.get_tpu_info()
        for name in ("vmem_capacity_bytes", "vmem_bytes", "vmem_size_bytes"):
            cap = getattr(info, name, None)
            if cap:
                phys = int(cap)
                break
    except Exception:
        pass
    return (phys * 3) // 4


def _hydra_kernel(x_ref, w_ref, b_ref, o_ref, summary_ref, q_stash_ref, *,
                  seq_len, tile_t, stash_q):
    # x_ref:       (1, tile_t, Dp) f32 activation tile
    # w_ref:       (4, Dp, Dp)     bf16 [Wq, Wk, Wv, Wout], constant block index
    # b_ref:       (4, Dp)         f32  [bq, bk, bv, bout], constant block index
    # o_ref:       (1, tile_t, Dp) output tile (written in phase 1 only)
    # summary_ref: (1, Dp)         f32 running sum_T(normalize(k) * v)
    # q_stash_ref: (NT, tile_t, Dp) bf16 normalized q stash (dummy if !stash_q)
    p = pl.program_id(1)   # phase: 0 = accumulate, 1 = apply + project
    t = pl.program_id(2)   # sequence tile
    eps = jnp.float32(1e-12)

    @pl.when(jnp.logical_and(p == 0, t == 0))
    def _():
        summary_ref[...] = jnp.zeros_like(summary_ref)

    @pl.when(p == 0)
    def _():
        x = x_ref[0].astype(jnp.bfloat16)        # bf16 operand for the MXU
        k = jnp.dot(x, w_ref[1], preferred_element_type=jnp.float32) + b_ref[1:2, :]
        v = jnp.dot(x, w_ref[2], preferred_element_type=jnp.float32) + b_ref[2:3, :]
        k = k * lax.rsqrt(jnp.sum(k * k, axis=-1, keepdims=True) + eps)
        kv = k * v                               # (tile_t, Dp), f32
        if seq_len % tile_t != 0:
            # Mask rows coming from the ragged sequence tail.
            row = t * tile_t + lax.broadcasted_iota(jnp.int32, (tile_t, 1), 0)
            kv = jnp.where(row < seq_len, kv, 0.0)
        # f32 accumulation of the global token summary.
        summary_ref[...] += jnp.sum(kv, axis=0, keepdims=True)

        if stash_q:
            # Compute + normalize q now and stash it so phase 1 never has to
            # re-read x from HBM.
            q = jnp.dot(x, w_ref[0], preferred_element_type=jnp.float32) + b_ref[0:1, :]
            q = q * lax.rsqrt(jnp.sum(q * q, axis=-1, keepdims=True) + eps)
            q_stash_ref[t] = q.astype(jnp.bfloat16)

    @pl.when(p == 1)
    def _():
        if stash_q:
            q = q_stash_ref[t].astype(jnp.float32)
        else:
            x = x_ref[0].astype(jnp.bfloat16)
            q = jnp.dot(x, w_ref[0], preferred_element_type=jnp.float32) + b_ref[0:1, :]
            q = q * lax.rsqrt(jnp.sum(q * q, axis=-1, keepdims=True) + eps)
        attn = (summary_ref[...] * q).astype(jnp.bfloat16)
        out = jnp.dot(attn, w_ref[3], preferred_element_type=jnp.float32) + b_ref[3:4, :]
        o_ref[0] = out.astype(o_ref.dtype)


def hydra_attention(x, w_qkv, b_qkv, w_out, b_out, *, tile_t=1024):
    """x: (B, T, D) float32. w_qkv: (D, 3D), w_out: (D, D). Returns (B, T, D)."""
    B, T, D = x.shape

    # Lane-dense feature dim (no-op when D is already a multiple of 128).
    d_pad = _round_up(max(D, 128), 128)
    vmem_cap = _vmem_budget_bytes()

    # Budget-aware sequence tile (multiple of 8, as large as fits).
    tile_t = max(8, min(_round_up(T, 8), _round_up(tile_t, 8)))

    def _working_set(tt, stash):
        nt_ = pl.cdiv(T, tt)
        ws = (2 * 2 * tt * d_pad * 4            # double-buffered x + out f32 tiles
              + 2 * 4 * d_pad * d_pad * 2       # bf16 weights (counted 2x, conservative)
              + 2 * 4 * d_pad * 4               # biases
              + d_pad * 4)                      # f32 summary accumulator
        if stash:
            ws += nt_ * tt * d_pad * 2          # bf16 normalized-q stash
        return ws

    while tile_t > 8 and _working_set(tile_t, False) > vmem_cap:
        tile_t = max(8, _round_up(tile_t // 2, 8))
    nt = pl.cdiv(T, tile_t)

    # Stash normalized q (saves the second HBM read of x) whenever the
    # full-sequence bf16 stash fits the VMEM budget; otherwise recompute.
    stash_q = _working_set(tile_t, True) <= vmem_cap

    x_p = x if d_pad == D else jnp.pad(x, ((0, 0), (0, 0), (0, d_pad - D)))

    # Pre-split fused qkv into aligned (D, D) weights, stack with W_out,
    # zero-pad to (d_pad, d_pad) and cast to bf16 for the MXU.
    wq, wk, wv = jnp.split(w_qkv, 3, axis=-1)
    pad_w = lambda w: jnp.pad(w, ((0, d_pad - D), (0, d_pad - D)))
    w_stack = jnp.stack([pad_w(wq), pad_w(wk), pad_w(wv), pad_w(w_out)],
                        axis=0).astype(jnp.bfloat16)

    bq, bk, bv = jnp.split(b_qkv, 3, axis=-1)
    pad_b = lambda b: jnp.pad(b, ((0, d_pad - D),))
    b_stack = jnp.stack([pad_b(bq), pad_b(bk), pad_b(bv), pad_b(b_out)],
                        axis=0).astype(jnp.float32)

    ws = _working_set(tile_t, stash_q)
    vmem_limit = int(min(max(int(1.25 * ws), 32 * 1024 * 1024), vmem_cap))

    if stash_q:
        # Pin x at the last phase-0 tile during phase 1: zero re-fetches.
        x_index = lambda b, p, t: (b, (1 - p) * t + p * (nt - 1), 0)
        stash_shape = (nt, tile_t, d_pad)
    else:
        x_index = lambda b, p, t: (b, t, 0)
        stash_shape = (1, 8, 128)               # unused dummy

    kernel = functools.partial(_hydra_kernel, seq_len=T, tile_t=tile_t,
                               stash_q=stash_q)

    out = pl.pallas_call(
        kernel,
        out_shape=jax.ShapeDtypeStruct((B, T, d_pad), x.dtype),
        grid_spec=pltpu.PrefetchScalarGridSpec(
            num_scalar_prefetch=0,
            grid=(B, 2, nt),  # (batch, phase, seq tile)
            in_specs=[
                pl.BlockSpec((1, tile_t, d_pad), x_index),                    # x
                pl.BlockSpec((4, d_pad, d_pad), lambda b, p, t: (0, 0, 0)),   # weights
                pl.BlockSpec((4, d_pad), lambda b, p, t: (0, 0)),             # biases
            ],
            # During phase 0 the output block index stays pinned at tile 0 and
            # is only written (and only then written back) in phase 1.
            out_specs=pl.BlockSpec((1, tile_t, d_pad),
                                   lambda b, p, t: (b, t * p, 0)),
            scratch_shapes=[
                pltpu.VMEM((1, d_pad), jnp.float32),        # summary accumulator
                pltpu.VMEM(stash_shape, jnp.bfloat16),      # normalized-q stash
            ],
        ),
        compiler_params=pltpu.CompilerParams(
            dimension_semantics=("parallel", "arbitrary", "arbitrary"),
            vmem_limit_bytes=vmem_limit,
        ),
    )(x_p, w_stack, b_stack)

    return out if d_pad == D else out[:, :, :D]


def hydra_attention_ref(x, w_qkv, b_qkv, w_out, b_out):
    """Plain-JAX f32 reference matching the PyTorch forward (mask=None, p=0)."""
    qkv = x @ w_qkv + b_qkv
    q, k, v = jnp.split(qkv, 3, axis=-1)
    q = q / jnp.linalg.norm(q, axis=-1, keepdims=True)
    k = k / jnp.linalg.norm(k, axis=-1, keepdims=True)
    kvw = k * v
    out = jnp.sum(kvw, axis=-2, keepdims=True) * q
    return out @ w_out + b_out


def _make_params(key, D):
    k1, k2, k3, k4 = jax.random.split(key, 4)
    bound = 1.0 / jnp.sqrt(jnp.float32(D))
    w_qkv = jax.random.uniform(k1, (D, 3 * D), jnp.float32, -bound, bound)
    b_qkv = jax.random.uniform(k2, (3 * D,), jnp.float32, -bound, bound)
    w_out = jax.random.uniform(k3, (D, D), jnp.float32, -bound, bound)
    b_out = jax.random.uniform(k4, (D,), jnp.float32, -bound, bound)
    return w_qkv, b_qkv, w_out, b_out


if __name__ == "__main__":
    key = jax.random.PRNGKey(0)
    kp, kx1, kx2 = jax.random.split(key, 3)

    B, T, D = 2, 8, 32
    w_qkv, b_qkv, w_out, b_out = _make_params(kp, D)

    x = jax.random.normal(kx1, (B, T, D), dtype=jnp.float32)
    out = jax.block_until_ready(hydra_attention(x, w_qkv, b_qkv, w_out, b_out))
    ref = hydra_attention_ref(x, w_qkv, b_qkv, w_out, b_out)
    assert out.shape == (B, T, D)
    # bf16 MXU operands vs f32 reference -> loosened tolerance.
    assert jnp.allclose(out, ref, atol=3e-2, rtol=3e-2), "mismatch vs JAX reference"

    # Second shape with a ragged sequence length (exercises the in-kernel tail
    # masking / no-T-padding path).
    x2 = jax.random.normal(kx2, (1, 13, D), dtype=jnp.float32)
    out2 = jax.block_until_ready(hydra_attention(x2, w_qkv, b_qkv, w_out, b_out))
    ref2 = hydra_attention_ref(x2, w_qkv, b_qkv, w_out, b_out)
    assert out2.shape == (1, 13, D)
    assert jnp.allclose(out2, ref2, atol=3e-2, rtol=3e-2), "mismatch (ragged T)"

    print("KERNEL_OK")
</pallas_src>

<mosaic_0001>
module attributes {stable_mosaic.version = 11 : i64} {
  func.func @_hydra_kernel(%arg0: i32, %arg1: i32, %arg2: i32, %arg3: memref<1x8x128xf32, #tpu.memory_space<vmem>>, %arg4: memref<4x128x128xbf16, #tpu.memory_space<vmem>>, %arg5: memref<4x128xf32, #tpu.memory_space<vmem>>, %arg6: memref<1x8x128xf32, #tpu.memory_space<vmem>>, %arg7: memref<1x128xf32, #tpu.memory_space<vmem>>, %arg8: memref<1x8x128xbf16, #tpu.memory_space<vmem>>) attributes {dimension_semantics = [#tpu.dimension_semantics<parallel>, #tpu.dimension_semantics<arbitrary>, #tpu.dimension_semantics<arbitrary>], iteration_bounds = array<i64: 2, 2, 1>, scalar_prefetch = 0 : i64, scratch_operands = 2 : i64, tpu.core_type = #tpu.core_type<tc>, window_params = [{transform_indices = @transform_0, window_bounds = array<i64: 1, 8, 128>}, {pipeline_mode = #tpu.pipeline_mode<synchronous>, transform_indices = @transform_1, window_bounds = array<i64: 4, 128, 128>}, {pipeline_mode = #tpu.pipeline_mode<synchronous>, transform_indices = @transform_2, window_bounds = array<i64: 4, 128>}, {transform_indices = @transform_3, window_bounds = array<i64: 1, 8, 128>}]} {
    %c0_i32 = arith.constant 0 : i32
    %0 = arith.cmpi eq, %arg1, %c0_i32 : i32
    %c0_i32_0 = arith.constant 0 : i32
    %1 = arith.cmpi eq, %arg2, %c0_i32_0 : i32
    %2 = arith.andi %0, %1 : i1
    %3 = arith.extui %2 : i1 to i32
    %c0_i32_1 = arith.constant 0 : i32
    %4 = arith.cmpi ne, %3, %c0_i32_1 : i32
    scf.if %4 {
      %cst_5 = arith.constant 0.000000e+00 : f32
      %11 = vector.broadcast %cst_5 : f32 to vector<1x128xf32>
      %c0 = arith.constant 0 : index
      %c0_6 = arith.constant 0 : index
      %12 = vector.load %arg7[%c0, %c0_6] : memref<1x128xf32, #tpu.memory_space<vmem>>, vector<1x128xf32>
      tpu.vector_store %arg7[%c0, %c0_6], %11 {strides = array<i32>} : memref<1x128xf32, #tpu.memory_space<vmem>>, vector<1x128xf32>,
    } else {
    }
    %c0_i32_2 = arith.constant 0 : i32
    %5 = arith.cmpi eq, %arg1, %c0_i32_2 : i32
    %6 = arith.extui %5 : i1 to i32
    %cst = arith.constant 9.99999996E-13 : f32
    %c0_i32_3 = arith.constant 0 : i32
    %7 = arith.cmpi ne, %6, %c0_i32_3 : i32
    scf.if %7 {
      %c0 = arith.constant 0 : index
      %c0_5 = arith.constant 0 : index
      %c0_6 = arith.constant 0 : index
      %11 = vector.load %arg3[%c0, %c0_5, %c0_6] : memref<1x8x128xf32, #tpu.memory_space<vmem>>, vector<1x8x128xf32>
      %12 = vector.shape_cast %11 : vector<1x8x128xf32> to vector<8x128xf32>
      %13 = arith.truncf %12 : vector<8x128xf32> to vector<8x128xbf16>
      %c1 = arith.constant 1 : index
      %c0_7 = arith.constant 0 : index
      %c0_8 = arith.constant 0 : index
      %14 = vector.load %arg4[%c1, %c0_7, %c0_8] : memref<4x128x128xbf16, #tpu.memory_space<vmem>>, vector<1x128x128xbf16>
      %15 = vector.shape_cast %14 : vector<1x128x128xbf16> to vector<128x128xbf16>
      %cst_9 = arith.constant dense<0.000000e+00> : vector<8x128xf32>
      %16 = tpu.matmul %13, %15, %cst_9 {dimension_numbers = #tpu.dot_dimension_numbers<[1], [0], [0], [1], [0, 0, 1, 1], [], []>} : vector<8x128xbf16>, vector<128x128xbf16>, vector<8x128xf32> -> vector<8x128xf32>
      %c1_10 = arith.constant 1 : index
      %c0_11 = arith.constant 0 : index
      %17 = vector.load %arg5[%c1_10, %c0_11] : memref<4x128xf32, #tpu.memory_space<vmem>>, vector<1x128xf32>
      %18 = vector.broadcast %17 : vector<1x128xf32> to vector<8x128xf32>
      %19 = arith.addf %16, %18 : vector<8x128xf32>
      %c2 = arith.constant 2 : index
      %c0_12 = arith.constant 0 : index
      %c0_13 = arith.constant 0 : index
      %20 = vector.load %arg4[%c2, %c0_12, %c0_13] : memref<4x128x128xbf16, #tpu.memory_space<vmem>>, vector<1x128x128xbf16>
      %21 = vector.shape_cast %20 : vector<1x128x128xbf16> to vector<128x128xbf16>
      %cst_14 = arith.constant dense<0.000000e+00> : vector<8x128xf32>
      %22 = tpu.matmul %13, %21, %cst_14 {dimension_numbers = #tpu.dot_dimension_numbers<[1], [0], [0], [1], [0, 0, 1, 1], [], []>} : vector<8x128xbf16>, vector<128x128xbf16>, vector<8x128xf32> -> vector<8x128xf32>
      %c2_15 = arith.constant 2 : index
      %c0_16 = arith.constant 0 : index
      %23 = vector.load %arg5[%c2_15, %c0_16] : memref<4x128xf32, #tpu.memory_space<vmem>>, vector<1x128xf32>
      %24 = vector.broadcast %23 : vector<1x128xf32> to vector<8x128xf32>
      %25 = arith.addf %22, %24 : vector<8x128xf32>
      %26 = arith.mulf %19, %19 : vector<8x128xf32>
      %cst_17 = arith.constant dense<0.000000e+00> : vector<8xf32>
      %27 = vector.multi_reduction <add>, %26, %cst_17 [1] : vector<8x128xf32> to vector<8xf32>
      %28 = vector.shape_cast %27 : vector<8xf32> to vector<8x1xf32>
      %29 = vector.broadcast %cst : f32 to vector<8x1xf32>
      %30 = arith.addf %28, %29 : vector<8x1xf32>
      %31 = math.rsqrt %30 : vector<8x1xf32>
      %32 = vector.broadcast %31 : vector<8x1xf32> to vector<8x128xf32>
      %33 = arith.mulf %19, %32 : vector<8x128xf32>
      %34 = arith.mulf %33, %25 : vector<8x128xf32>
      %c0_18 = arith.constant 0 : index
      %c0_19 = arith.constant 0 : index
      %35 = vector.load %arg7[%c0_18, %c0_19] : memref<1x128xf32, #tpu.memory_space<vmem>>, vector<1x128xf32>
      %cst_20 = arith.constant dense<0.000000e+00> : vector<128xf32>
      %36 = vector.multi_reduction <add>, %34, %cst_20 [0] : vector<8x128xf32> to vector<128xf32>
      %37 = vector.shape_cast %36 : vector<128xf32> to vector<1x128xf32>
      %38 = arith.addf %35, %37 : vector<1x128xf32>
      %c0_21 = arith.constant 0 : index
      %c0_22 = arith.constant 0 : index
      %39 = vector.load %arg7[%c0_21, %c0_22] : memref<1x128xf32, #tpu.memory_space<vmem>>, vector<1x128xf32>
      tpu.vector_store %arg7[%c0_21, %c0_22], %38 {strides = array<i32>} : memref<1x128xf32, #tpu.memory_space<vmem>>, vector<1x128xf32>,
      %c0_23 = arith.constant 0 : index
      %c0_24 = arith.constant 0 : index
      %c0_25 = arith.constant 0 : index
      %40 = vector.load %arg4[%c0_23, %c0_24, %c0_25] : memref<4x128x128xbf16, #tpu.memory_space<vmem>>, vector<1x128x128xbf16>
      %41 = vector.shape_cast %40 : vector<1x128x128xbf16> to vector<128x128xbf16>
      %cst_26 = arith.constant dense<0.000000e+00> : vector<8x128xf32>
      %42 = tpu.matmul %13, %41, %cst_26 {dimension_numbers = #tpu.dot_dimension_numbers<[1], [0], [0], [1], [0, 0, 1, 1], [], []>} : vector<8x128xbf16>, vector<128x128xbf16>, vector<8x128xf32> -> vector<8x128xf32>
      %c0_27 = arith.constant 0 : index
      %c0_28 = arith.constant 0 : index
      %43 = vector.load %arg5[%c0_27, %c0_28] : memref<4x128xf32, #tpu.memory_space<vmem>>, vector<1x128xf32>
      %44 = vector.broadcast %43 : vector<1x128xf32> to vector<8x128xf32>
      %45 = arith.addf %42, %44 : vector<8x128xf32>
      %46 = arith.mulf %45, %45 : vector<8x128xf32>
      %cst_29 = arith.constant dense<0.000000e+00> : vector<8xf32>
      %47 = vector.multi_reduction <add>, %46, %cst_29 [1] : vector<8x128xf32> to vector<8xf32>
      %48 = vector.shape_cast %47 : vector<8xf32> to vector<8x1xf32>
      %49 = vector.broadcast %cst : f32 to vector<8x1xf32>
      %50 = arith.addf %48, %49 : vector<8x1xf32>
      %51 = math.rsqrt %50 : vector<8x1xf32>
      %52 = vector.broadcast %51 : vector<8x1xf32> to vector<8x128xf32>
      %53 = arith.mulf %45, %52 : vector<8x128xf32>
      %54 = arith.truncf %53 : vector<8x128xf32> to vector<8x128xbf16>
      %55 = arith.index_cast %arg2 : i32 to index
      %c0_30 = arith.constant 0 : index
      %c0_31 = arith.constant 0 : index
      %56 = vector.load %arg8[%55, %c0_30, %c0_31] : memref<1x8x128xbf16, #tpu.memory_space<vmem>>, vector<1x8x128xbf16>
      %57 = vector.shape_cast %56 : vector<1x8x128xbf16> to vector<8x128xbf16>
      %58 = vector.shape_cast %54 : vector<8x128xbf16> to vector<1x8x128xbf16>
      tpu.vector_store %arg8[%55, %c0_30, %c0_31], %58 {strides = array<i32>} : memref<1x8x128xbf16, #tpu.memory_space<vmem>>, vector<1x8x128xbf16>,
    } else {
    }
    %c1_i32 = arith.constant 1 : i32
    %8 = arith.cmpi eq, %arg1, %c1_i32 : i32
    %9 = arith.extui %8 : i1 to i32
    %c0_i32_4 = arith.constant 0 : i32
    %10 = arith.cmpi ne, %9, %c0_i32_4 : i32
    scf.if %10 {
      %11 = arith.index_cast %arg2 : i32 to index
      %c0 = arith.constant 0 : index
      %c0_5 = arith.constant 0 : index
      %12 = vector.load %arg8[%11, %c0, %c0_5] : memref<1x8x128xbf16, #tpu.memory_space<vmem>>, vector<1x8x128xbf16>
      %13 = vector.shape_cast %12 : vector<1x8x128xbf16> to vector<8x128xbf16>
      %14 = arith.extf %13 : vector<8x128xbf16> to vector<8x128xf32>
      %c0_6 = arith.constant 0 : index
      %c0_7 = arith.constant 0 : index
      %15 = vector.load %arg7[%c0_6, %c0_7] : memref<1x128xf32, #tpu.memory_space<vmem>>, vector<1x128xf32>
      %16 = vector.broadcast %15 : vector<1x128xf32> to vector<8x128xf32>
      %17 = arith.mulf %16, %14 : vector<8x128xf32>
      %18 = arith.truncf %17 : vector<8x128xf32> to vector<8x128xbf16>
      %c3 = arith.constant 3 : index
      %c0_8 = arith.constant 0 : index
      %c0_9 = arith.constant 0 : index
      %19 = vector.load %arg4[%c3, %c0_8, %c0_9] : memref<4x128x128xbf16, #tpu.memory_space<vmem>>, vector<1x128x128xbf16>
      %20 = vector.shape_cast %19 : vector<1x128x128xbf16> to vector<128x128xbf16>
      %cst_10 = arith.constant dense<0.000000e+00> : vector<8x128xf32>
      %21 = tpu.matmul %18, %20, %cst_10 {dimension_numbers = #tpu.dot_dimension_numbers<[1], [0], [0], [1], [0, 0, 1, 1], [], []>} : vector<8x128xbf16>, vector<128x128xbf16>, vector<8x128xf32> -> vector<8x128xf32>
      %c3_11 = arith.constant 3 : index
      %c0_12 = arith.constant 0 : index
      %22 = vector.load %arg5[%c3_11, %c0_12] : memref<4x128xf32, #tpu.memory_space<vmem>>, vector<1x128xf32>
      %23 = vector.broadcast %22 : vector<1x128xf32> to vector<8x128xf32>
      %24 = arith.addf %21, %23 : vector<8x128xf32>
      %c0_13 = arith.constant 0 : index
      %c0_14 = arith.constant 0 : index
      %c0_15 = arith.constant 0 : index
      %25 = vector.load %arg6[%c0_13, %c0_14, %c0_15] : memref<1x8x128xf32, #tpu.memory_space<vmem>>, vector<1x8x128xf32>
      %26 = vector.shape_cast %25 : vector<1x8x128xf32> to vector<8x128xf32>
      %27 = vector.shape_cast %24 : vector<8x128xf32> to vector<1x8x128xf32>
      tpu.vector_store %arg6[%c0_13, %c0_14, %c0_15], %27 {strides = array<i32>} : memref<1x8x128xf32, #tpu.memory_space<vmem>>, vector<1x8x128xf32>,
    } else {
    }
    return
  }
  func.func @transform_0(%arg0: i32, %arg1: i32, %arg2: i32) -> (i32, i32, i32) {
    %c1_i32 = arith.constant 1 : i32
    %0 = arith.subi %c1_i32, %arg1 : i32
    %1 = arith.muli %0, %arg2 : i32
    %c0_i32 = arith.constant 0 : i32
    %2 = arith.muli %arg1, %c0_i32 : i32
    %3 = arith.addi %1, %2 : i32
    %c0_i32_0 = arith.constant 0 : i32
    %c0_i32_1 = arith.constant 0 : i32
    return %arg0, %3, %c0_i32_0 : i32, i32, i32
  }
  func.func @transform_1(%arg0: i32, %arg1: i32, %arg2: i32) -> (i32, i32, i32) {
    %c0_i32 = arith.constant 0 : i32
    %c0_i32_0 = arith.constant 0 : i32
    %c0_i32_1 = arith.constant 0 : i32
    %c0_i32_2 = arith.constant 0 : i32
    return %c0_i32, %c0_i32_0, %c0_i32_1 : i32, i32, i32
  }
  func.func @transform_2(%arg0: i32, %arg1: i32, %arg2: i32) -> (i32, i32) {
    %c0_i32 = arith.constant 0 : i32
    %c0_i32_0 = arith.constant 0 : i32
    %c0_i32_1 = arith.constant 0 : i32
    return %c0_i32, %c0_i32_0 : i32, i32
  }
  func.func @transform_3(%arg0: i32, %arg1: i32, %arg2: i32) -> (i32, i32, i32) {
    %0 = arith.muli %arg2, %arg1 : i32
    %c0_i32 = arith.constant 0 : i32
    %c0_i32_0 = arith.constant 0 : i32
    return %arg0, %0, %c0_i32 : i32, i32, i32
  }
}

</mosaic_0001>

<bundles_post_ra>
// kernel: tpu_custom_call.1
= control target key start
LH: loop header
LB: loop body
LE: loop exit
PB: predicated region body
PF: predicated region fallthrough
CT: control target
= control target key end

     0   :  { %s1634_s0 = inlined_call_operand.hbm [shape: f32[2,8,128], index: 0, kind: input, shape index: {}]   ;;  %s1635_s1 = inlined_call_operand.hbm [shape: bf16[4,128,128], index: 1, kind: input, shape index: {}]   ;;  %s1636_s2 = inlined_call_operand.hbm [shape: f32[4,128], index: 2, kind: input, shape index: {}]   ;;  %s1637_s3 = inlined_call_operand.hbm [shape: f32[2,8,128], index: 3, kind: output, shape index: {}]  }
   0x1   :  { %1642 = sst [smem:[#allocation15_spill]] %s1635_s1 }
   0x2   :  { %1643 = sst [smem:[#allocation16_spill]] %s1636_s2 }
   0x3   :  { %8 = vsyncpa [#allocation5], 0 }
   0x4   :  { %10 = vsyncpa [#allocation5 + $0x1], 0 }
   0x5   :  { %11 = vsyncpa [#allocation8], 0 }
   0x6   :  { %12 = vsyncpa [#allocation6], 0 }
   0x7   :  { %14 = vsyncpa [#allocation6 + $0x1], 0  ;;  %s1398_s12 = smov 0   ;;  %s1400_s13 = smov 0  }
   0x8   :  { %s1402_s14 = smov 0   ;;  %s1404_s15 = smov 0  }
   0x9   :  { %s1406_s16 = smov 0   ;;  %s1408_s17 = smov 0  }
   0xa   :  { %s1410_s18 = smov 0   ;;  %s1412_s19 = smov 0  }
   0xb LB: > { %s869_s20 = sadd.s32 4294967295, %s1365_s19   ;;  %s870_s21 = sadd.s32 4294967294, %s1365_s19   ;;  %s1365_s19 = sphi %s1412_s19, %s20_s19   ;;  %s1361_s18 = sphi %s1410_s18, %s1666_s18   ;;  %s1357_s17 = sphi %s1408_s17, %s1665_s17   ;;  %s1353_s16 = sphi %s1406_s16, %s1664_s16   ;;  %s1349_s15 = sphi %s1404_s15, %s1663_s15   ;;  %s1345_s14 = sphi %s1402_s14, %s1662_s14   ;;  %s1341_s13 = sphi %s1400_s13, %s1661_s13   ;;  %s1337_s12 = sphi %s1398_s12, %s1660_s12  }
   0xc   : > { %p65_p0 = scmp.ne.s32.totalorder %s1341_s13, %s1337_s12  ;;  %p1442_p1 = scmp.eq.s32.totalorder %s869_s20, 0 }
   0xd   : > { %p1446_p2 = scmp.eq.s32.totalorder %s869_s20, 3  ;;  %p141_p3 = scmp.eq.s32.totalorder %s870_s21, 3 }
   0xe   : > { %s1644_s22 = scalar_select %p1442_p1, 1, 0 }
   0xf   : > { %p1452_p4 = por %p1442_p1, %p65_p0  ;;  %p871_p5 = scmp.ge.s32.totalorder %s1365_s19, 1 }
  0x10   : > { %p1457_p6 = por %p141_p3, %p65_p0  ;;  %p148_p7 = scmp.lt.s32.totalorder %s1365_s19, 5 }
  0x11   : > { %s1646_s24 = scalar_select %p1452_p4, 1, 0 }
  0x12   : > { %s1647_s25 = scalar_select %p1457_p6, 1, 0 }
  0x13   : > { %p1462_p8 = pnand %p871_p5, %p148_p7  ;;  %s1367_s27 = smov [#allocation7]  }
  0x14   : > { %s160_s28 = sshll.u32 %s1367_s27, 4  ;;  %s1368_s30 = smov [#allocation9]   ;;  %s161_s28 = int_to_ptr.vmem [resolvable:$true] %s160_s28 }
  0x15   : > { %p1055_p9 = pneg %p1462_p8  ;;  %s174_s4 = sshll.u32 %s1368_s30, 4  ;;  %s175_s4 = int_to_ptr.vmem [resolvable:$true] %s174_s4 }
  0x16   : > { %s1196_s5 = scalar_lea.vmem %s161_s28, 4096  ;;  %p1204_p3 = scmp.lt.s32.totalorder %s161_s28, %s161_s28 }
  0x17   : > { %p1470_p10 = pnand %p1055_p9, %p1442_p1  ;;  %p1197_p12 = scmp.ne.s32.totalorder %s161_s28, %s1196_s5 }
  0x18   : > { %p1205_p5 = scmp.lt.s32.totalorder %s1196_s5, %s1196_s5 }
  0x19   : > { %p1187_p11 = pneg %p1470_p10 }
  0x1a   : > { %p1206_p7 = por %p1205_p5, %p1204_p3 }
  0x1b   : > { %p1199_p13 = pnand %p1197_p12, %p1187_p11 }
  0x1d   : > { %p1200_p0 = pneg %p1199_p13 }
  0x1f   : > { %p1207_p9 = pnand %p1206_p7, %p1200_p0 }
  0x21   : > { %1210 = shalt.err (!%p1207_p9)
}
  0x22   : > { %s1369_s6 = smov 64   ;;  %s1370_s7 = smov 4  }
  0x23   : > { %s1650_s1 = sld [smem:[#allocation15_spill]]  ;;  %s1222_s10 = scalar_lea.vmem %s175_s4, 64 }
  0x24   : > { %p1223_p6 = scmp.ne.s32.totalorder %s175_s4, %s1222_s10  ;;  %p1230_p1 = scmp.lt.s32.totalorder %s175_s4, %s175_s4 }
  0x25   : > { %p1231_p4 = scmp.lt.s32.totalorder %s1222_s10, %s1222_s10 }
  0x26   : > { %p1225_p12 = pnand %p1223_p6, %p1187_p11 }
  0x27   : > { %p1232_p3 = por %p1231_p4, %p1230_p1 }
  0x28   : > { %p1226_p13 = pneg %p1225_p12 }
  0x29   : > { %1058 = dma.hbm_to_vmem [thread:$0]  (!%p1470_p10), %s1650_s1, 4096, %s161_s28, [#allocation8], %s1369_s6, %s1369_s6, %s1370_s7  }
  0x2a   : > { %p1233_p0 = pnand %p1232_p3, %p1226_p13 }
  0x2c   : > { %1236 = shalt.err (!%p1233_p0)
}
  0x2d   : > { %s1651_s2 = sld [smem:[#allocation16_spill]]  ;;  %s35_s21 = sadd.s32 1, %s1357_s17 }
  0x2e   : > { %s39_s27 = sadd.s32 1, %s1361_s18  ;;  %p37_p1 = scmp.ge.s32.totalorder %s35_s21, 2 }
  0x2f   : > { %s52_s28 = sadd.s32 1, %s1345_s14  ;;  %p59_p4 = scmp.ne.s32.totalorder %s1345_s14, %s1341_s13 }
  0x30   : > { %p60_p6 = scmp.eq.s32.totalorder %s1365_s19, 0  ;;  %s1668_s21 = smov (%p37_p1, %s35_s21), 0 }
  0x31   : > { %s1670_s27 = smov (!%p37_p1, %s39_s27), %s1361_s18  ;;  %p1507_p5 = por %p1446_p2, %p59_p4 }
  0x32   : > { %p1501_p11 = por %p60_p6, %p59_p4  ;;  %p1072_p7 = scmp.lt.s32.totalorder %s1365_s19, 4 }
  0x33   : > { %1061 = dma.hbm_to_vmem [thread:$0]  (!%p1470_p10), %s1651_s2, 64, %s175_s4, [#allocation8]  }
  0x34   : > { %p41_p10 = scmp.ge.s32.totalorder %s1670_s27, 2  ;;  %s185_s4 = sand.u32 1, %s1345_s14  }
  0x35   : > { %s876_s5 = sshll.u32 %s1361_s18, 7  ;;  %s875_s6 = sshll.u32 %s185_s4, 3 }
  0x36   : > { %s1672_s27 = smov (%p41_p10, %s1670_s27), 0  ;;  %s197_s10 = scalar_lea.hbm %s1634_s0, %s876_s5 }
  0x37   : > { %1654 = sst [smem:[#allocation14_spill]] %s1672_s27  ;;  %s47_s7 = ssub.s32 %s1361_s18, %s1672_s27 }
  0x38   : > { %p50_p9 = scmp.eq.s32.totalorder %s47_s7, 0  ;;  %s189_s23 = scalar_lea.vmem [#allocation4], %s875_s6 }
  0x39   : > { %s199_s11 = sshll.u32 %s189_s23, 4  ;;  %p1523_p2 = pnand %p1072_p7, %p1501_p11  ;;  %s200_s11 = int_to_ptr.vmem [resolvable:$true] %s199_s11 }
  0x3a   : > { %s1528_s1 = scalar_select %p50_p9, %s1345_s14, %s52_s28  }
  0x3b   : > { %s186_s2 = scalar_lea.sflag [#allocation5], %s185_s4  ;;  %p1239_p12 = pneg %p1523_p2 }
  0x3c   : > { %s1250_s27 = scalar_lea.vmem %s200_s11, 128  ;;  %s1371_s7 = smov [#allocation4]  }
  0x3d   : > { %p1251_p13 = scmp.ne.s32.totalorder %s200_s11, %s1250_s27  ;;  %s1255_s5 = sshll.u32 %s1371_s7, 4  ;;  %s1256_s5 = int_to_ptr.vmem [resolvable:$false] %s1255_s5 }
  0x3e   : > { %s1257_s6 = scalar_lea.vmem %s1256_s5, 256  ;;  %p1258_p1 = scmp.lt.s32.totalorder %s200_s11, %s1256_s5 }
  0x3f   : > { %p1253_p3 = pnand %p1251_p13, %p1239_p12  ;;  %p1259_p4 = scmp.lt.s32.totalorder %s1257_s6, %s1250_s27 }
  0x41   : > { %p1254_p0 = pneg %p1253_p3  ;;  %p1260_p6 = por %p1259_p4, %p1258_p1 }
  0x43   : > { %p1261_p11 = pnand %p1260_p6, %p1254_p0 }
  0x45   : > { %1264 = shalt.err (!%p1261_p11)
}
  0x46   : > { %1065 = dma.hbm_to_vmem [thread:$0]  (!%p1523_p2), %s197_s10, 128, %s200_s11, %s186_s2  }
  0x47   : > { %208 = sbr.rel (%p1462_p8) target bundleno = 777 (0x309), region = 32  ;;  %s1537_s28 = sand.u32 (!%p1462_p8), 1, %s1341_s13  }
  0x48   : > { %s878_s29 = sshll.u32 (!%p1462_p8), %s1537_s28, 3  ;;  %s211_s4 = scalar_lea.sflag (!%p1462_p8), [#allocation5], %s1537_s28 }
  0x49   : > { %s1541_s8 = scalar_lea.vmem (!%p1462_p8), [#allocation4], %s878_s29  ;;  %p1656_p10 = scmp.ne.s32.totalorder (!%p1462_p8), %s1646_s24, 0 }
  0x4c   : > { %1324 = dma.done.wait (%p1656_p10), %s211_s4, 128  }
  0x4d   : > { %1326 = vsyncadd (%p1656_p10), %s211_s4, 4294967168  ;;  %p1657_p7 = scmp.ne.s32.totalorder %s1644_s22, 0 }
  0x4f   : > { %1328 = dma.done.wait (%p1657_p7), [#allocation8], 4160  }
  0x50   : > { %1330 = vsyncadd (%p1657_p7), [#allocation8], 4294963136  ;;  %p249_p8 = scmp.eq.s32.totalorder %s1349_s15, 0  ;;  %s1552_s2 = scalar_lea.vmem [#allocation10], %s878_s29 }
  0x51   : > { %v1372_v0 = vmov (%p249_p8), 0.0  }
  0x52   : > { %254 = sbr.rel (!%p249_p8) target bundleno = 87 (0x57), region = 48  ;;  %255 = vst [vmem:[#allocation2] sm:$0x1] (%p249_p8), %v1372_v0 }
  0x57 PF: > { %p883_p9 = scmp.ne.s32.totalorder %s1349_s15, 0 }
  0x59   : > { %258 = sbr.rel (%p883_p9) target bundleno = 515 (0x203), region = 52 }
  0x5e   : > { %v1149_v1 = vld [vmem:[#allocation7 + $0x78] sm:$0xff]   ;;  %v1373_v2 = vmov 0.0   ;;  %v1150_v3 = vld [vmem:[#allocation7 + $0x70] sm:$0xff]   ;;  %vm1374_vm0 = vmmov 0   ;;  %v1151_v4 = vld [vmem:[#allocation7 + $0x68] sm:$0xff]  }
  0x5f   : > { %963 = vmatprep.subr.bf16.mxu0 %v1373_v2  ;;  %983 = vmatprep.subr.bf16.mxu1 %v1373_v2  ;;  %v1152_v5 = vld [vmem:[#allocation7 + $0x60] sm:$0xff]   ;;  %v1153_v6 = vld [vmem:[#allocation7 + $0x58] sm:$0xff]   ;;  %v1154_v8 = vld [vmem:[#allocation7 + $0x50] sm:$0xff]  }
  0x60   : > { %964 = vmatpush3.bf16.msra.mxu0 %v1149_v1  ;;  %979 = vmatprep.mubr.msk.bf16.mxu0 %vm1374_vm0, %v1373_v2  ;;  %v1165_v7 = vld [vmem:[#allocation7 + $0xb8] sm:$0xff]   ;;  %v1166_v9 = vld [vmem:[#allocation7 + $0xb0] sm:$0xff]   ;;  %v1155_v10 = vld [vmem:[#allocation7 + $0x48] sm:$0xff]  }
  0x61   : > { %965 = vmatprep.subr.bf16.mxu0 %v1373_v2  ;;  %999 = vmatprep.mubr.msk.bf16.mxu1 %vm1374_vm0, %v1373_v2  ;;  %v1167_v11 = vld [vmem:[#allocation7 + $0xa8] sm:$0xff]   ;;  %v1156_v12 = vld [vmem:[#allocation7 + $0x40] sm:$0xff]   ;;  %v259_v13 = vld [vmem:[%s1541_s8] sm:$0xff] }
  0x62   : > { %984 = vmatpush3.bf16.msra.mxu1 %v1165_v7  ;;  %v1168_v14 = vld [vmem:[#allocation7 + $0xa0] sm:$0xff]   ;;  %v260_v15 = vpack.c.bf16 %v259_v13, %v259_v13  ;;  %v1157_v16 = vld [vmem:[#allocation7 + $0x38] sm:$0xff]   ;;  %v1158_v18 = vld [vmem:[#allocation7 + $0x30] sm:$0xff]  }
  0x63   : > { %985 = vmatprep.subr.bf16.mxu1 %v1373_v2  ;;  %v1169_v17 = vld [vmem:[#allocation7 + $0x98] sm:$0xff]   ;;  %v1170_v19 = vld [vmem:[#allocation7 + $0x90] sm:$0xff]   ;;  %v1159_v20 = vld [vmem:[#allocation7 + $0x28] sm:$0xff]  }
  0x64   : > { %966 = vmatpush3.bf16.msra.mxu0 %v1150_v3  ;;  %v1171_v21 = vld [vmem:[#allocation7 + $0x88] sm:$0xff]   ;;  %v1160_v22 = vld [vmem:[#allocation7 + $0x20] sm:$0xff]   ;;  %v1161_v24 = vld [vmem:[#allocation7 + $0x18] sm:$0xff]  }
  0x65   : > { %967 = vmatprep.subr.bf16.mxu0 %v1373_v2  ;;  %v1172_v23 = vld [vmem:[#allocation7 + $0x80] sm:$0xff]   ;;  %v1162_v25 = vld [vmem:[#allocation7 + $0x10] sm:$0xff]   ;;  %v1163_v26 = vld [vmem:[#allocation7 + $0x8] sm:$0xff]  }
  0x66   : > { %986 = vmatpush3.bf16.msra.mxu1 %v1166_v9  ;;  %v1164_v27 = vld [vmem:[#allocation7] sm:$0xff]   ;;  %v488_v58 = vld [vmem:[#allocation2] sm:$0x1] }
  0x67   : > { %987 = vmatprep.subr.bf16.mxu1 %v1373_v2  ;;  %v884_v28 = vld [vmem:[#allocation9 + $0x1] ss:$0 sm:$0xff]  ;;  %v902_v39 = vld [vmem:[#allocation9] ss:$0 sm:$0xff]  ;;  %v893_v48 = vld [vmem:[#allocation9 + $0x2] ss:$0 sm:$0xff] }
  0x68   : > { %968 = vmatpush3.bf16.msra.mxu0 %v1151_v4 }
  0x69   : > { %969 = vmatprep.subr.bf16.mxu0 %v1373_v2 }
  0x6a   : > { %988 = vmatpush3.bf16.msra.mxu1 %v1167_v11 }
  0x6b   : > { %989 = vmatprep.subr.bf16.mxu1 %v1373_v2 }
  0x6c   : > { %970 = vmatpush3.bf16.msra.mxu0 %v1152_v5 }
  0x6d   : > { %971 = vmatprep.subr.bf16.mxu0 %v1373_v2 }
  0x6e   : > { %990 = vmatpush3.bf16.msra.mxu1 %v1168_v14 }
  0x6f   : > { %991 = vmatprep.subr.bf16.mxu1 %v1373_v2 }
  0x70   : > { %972 = vmatpush3.bf16.msra.mxu0 %v1153_v6 }
  0x71   : > { %973 = vmatprep.subr.bf16.mxu0 %v1373_v2 }
  0x72   : > { %992 = vmatpush3.bf16.msra.mxu1 %v1169_v17 }
  0x73   : > { %993 = vmatprep.subr.bf16.mxu1 %v1373_v2 }
  0x74   : > { %974 = vmatpush3.bf16.msra.mxu0 %v1154_v8 }
  0x75   : > { %975 = vmatprep.subr.bf16.mxu0 %v1373_v2 }
  0x76   : > { %994 = vmatpush3.bf16.msra.mxu1 %v1170_v19 }
  0x77   : > { %995 = vmatprep.subr.bf16.mxu1 %v1373_v2 }
  0x78   : > { %976 = vmatpush3.bf16.msra.mxu0 %v1155_v10 }
  0x79   : > { %977 = vmatprep.subr.bf16.mxu0 %v1373_v2 }
  0x7a   : > { %996 = vmatpush3.bf16.msra.mxu1 %v1171_v21 }
  0x7b   : > { %997 = vmatprep.subr.bf16.mxu1 %v1373_v2 }
  0x7c   : > { %978 = vmatpush3.bf16.msra.mxu0 %v1156_v12 }
  0x7d   : > { %1003 = vmatprep.subr.bf16.mxu0 %v1373_v2 }
  0x7e   : > { %998 = vmatpush3.bf16.msra.mxu1 %v1172_v23 }
  0x7f   : > { %980 = vmatmul.mubr.bf16.vlgmr.msra.gmra.mxu0 %v260_v15 }
  0x80   : > { %1004 = vmatpush3.bf16.msra.mxu0 %v1157_v16  ;;  %1019 = vmatprep.mubr.msk.bf16.mxu0 %vm1374_vm0, %v1373_v2 }
  0x81   : > { %1005 = vmatprep.subr.bf16.mxu0 %v1373_v2  ;;  %1000 = vmatmul.mubr.bf16.vlgmr.msra.gmra.mxu1 %v260_v15 }
  0x84   : > { %1006 = vmatpush3.bf16.msra.mxu0 %v1158_v18 }
  0x85   : > { %1007 = vmatprep.subr.bf16.mxu0 %v1373_v2 }
  0x88   : > { %1008 = vmatpush3.bf16.msra.mxu0 %v1159_v20 }
  0x89   : > { %1009 = vmatprep.subr.bf16.mxu0 %v1373_v2 }
  0x8c   : > { %1010 = vmatpush3.bf16.msra.mxu0 %v1160_v22 }
  0x8d   : > { %1011 = vmatprep.subr.bf16.mxu0 %v1373_v2 }
  0x90   : > { %1012 = vmatpush3.bf16.msra.mxu0 %v1161_v24 }
  0x91   : > { %1013 = vmatprep.subr.bf16.mxu0 %v1373_v2 }
  0x94   : > { %1014 = vmatpush3.bf16.msra.mxu0 %v1162_v25 }
  0x95   : > { %1015 = vmatprep.subr.bf16.mxu0 %v1373_v2 }
  0x98   : > { %1016 = vmatpush3.bf16.msra.mxu0 %v1163_v26 }
  0x99   : > { %1017 = vmatprep.subr.bf16.mxu0 %v1373_v2 }
  0x9c   : > { %1018 = vmatpush3.bf16.msra.mxu0 %v1164_v27 }
  0x9f   : > { %1020 = vmatmul.mubr.bf16.vlgmr.msra.gmra.mxu0 %v260_v15 }
 0x13f   : > { %v365_v29 = vpop.f32.mrf.mxu0 }
 0x140   : > { %v366_v30 = vadd.f32 %v884_v28, %v365_v29 }
 0x141   : > { %v981_v31 = vpop.f32.mrf.mxu0  ;;  %v475_v35 = vpop.f32.mrf.mxu1 }
 0x142   : > { %v481_v32 = vmul.f32 %v366_v30, %v366_v30  ;;  %v476_v49 = vadd.f32 %v893_v48, %v475_v35 }
 0x143   : > { %v368_v33 = vpop.f32.mrf.mxu0  ;;  %v1001_v36 = vpop.f32.mrf.mxu1 }
 0x144   : > { %482 = vadd.xlane.f32.xlu0 %v481_v32 }
 0x145   : > { %v982_v34 = vpop.f32.mrf.mxu0  ;;  %v478_v37 = vpop.f32.mrf.mxu1 }
 0x147   : > { %v1002_v38 = vpop.f32.mrf.mxu1 }
 0x15f   : > { %v600_v40 = vpop.f32.mrf.mxu0 }
 0x160   : > { %v601_v41 = vadd.f32 %v902_v39, %v600_v40 }
 0x161   : > { %v1021_v42 = vpop.f32.mrf.mxu0 }
 0x162   : > { %v606_v43 = vmul.f32 %v601_v41, %v601_v41 }
 0x163   : > { %v603_v44 = vpop.f32.mrf.mxu0 }
 0x164   : > { %607 = vadd.xlane.f32.xlu0 %v606_v43 }
 0x165   : > { %v1022_v45 = vpop.f32.mrf.mxu0 }
 0x1cd   : > { %v483_v46 = vpop.xlane.xlu0 %482 }
 0x1ce   : > { %v484_v47 = vadd.f32 1e-12, %v483_v46 }
 0x1d0   : > { %1173 = vrsqrt.f32 %v484_v47 }
 0x1dd   : > { %v1174_v50 = vpop.eup %1173 }
 0x1de   : > { %v486_v51 = vmul.f32 %v1174_v50, %v366_v30 }
 0x1e0   : > { %v487_v52 = vmul.f32 %v486_v51, %v476_v49 }
 0x1e2   : > { %v489_v53 = vrot.slane %v487_v52, 4 }
 0x1e4   : > { %v490_v54 = vadd.f32 %v489_v53, %v487_v52 }
 0x1e6   : > { %v491_v55 = vrot.slane %v490_v54, 2 }
 0x1e8   : > { %v492_v56 = vadd.f32 %v491_v55, %v490_v54 }
 0x1ea   : > { %v493_v57 = vrot.slane %v492_v56, 1 }
 0x1ec   : > { %v494_v59 = vadd.f32 %v493_v57, %v492_v56 }
 0x1ed   : > { %v608_v60 = vpop.xlane.xlu0 %607 }
 0x1ee   : > { %v495_v61 = vadd.f32 %v494_v59, %v488_v58  ;;  %v609_v62 = vadd.f32 1e-12, %v608_v60 }
 0x1f0   : > { %496 = vst [vmem:[#allocation2] sm:$0x1] %v495_v61  ;;  %1175 = vrsqrt.f32 %v609_v62 }
 0x1fd   : > { %v1176_v63 = vpop.eup %1175 }
 0x1fe   : > { %v611_v0 = vmul.f32 %v1176_v63, %v601_v41 }
 0x200   : > { %v612_v1 = vpack.c.bf16 %v611_v0, %v611_v0 }
 0x202   : > { %615 = vst [vmem:[#allocation3] sm:$0xf] %v612_v1 }
 0x203 PF: > { %p911_p2 = scmp.ne.s32.totalorder %s1349_s15, 1 }
 0x205   : > { %619 = sbr.rel (%p911_p2) target bundleno = 754 (0x2f2), region = 56 }
 0x20a   : > { %v1177_v2 = vld [vmem:[#allocation7 + $0xf8] sm:$0xff]   ;;  %v1375_v3 = vmov 0.0   ;;  %v1178_v4 = vld [vmem:[#allocation7 + $0xf0] sm:$0xff]   ;;  %vm1376_vm1 = vmmov 0   ;;  %v1179_v5 = vld [vmem:[#allocation7 + $0xe8] sm:$0xff]  }
 0x20b   : > { %1023 = vmatprep.subr.bf16.mxu0 %v1375_v3  ;;  %1039 = vmatprep.mubr.msk.bf16.mxu0 %vm1376_vm1, %v1375_v3  ;;  %v1180_v6 = vld [vmem:[#allocation7 + $0xe0] sm:$0xff]   ;;  %v1181_v7 = vld [vmem:[#allocation7 + $0xd8] sm:$0xff]   ;;  %v1182_v8 = vld [vmem:[#allocation7 + $0xd0] sm:$0xff]  }
 0x20c   : > { %1024 = vmatpush3.bf16.msra.mxu0 %v1177_v2  ;;  %v622_v9 = vld [vmem:[#allocation3] sm:$0xf]  ;;  %v912_v12 = vld [vmem:[#allocation2] ss:$0 sm:$0xff]  ;;  %v1184_v14 = vld [vmem:[#allocation7 + $0xc0] sm:$0xff]  }
 0x20d   : > { %1025 = vmatprep.subr.bf16.mxu0 %v1375_v3  ;;  %v623_v10 = vunpack.c.l.bf16 %v622_v9  ;;  %v1183_v11 = vld [vmem:[#allocation7 + $0xc8] sm:$0xff]   ;;  %v913_v16 = vld [vmem:[#allocation9 + $0x3] ss:$0 sm:$0xff] }
 0x20f   : > { %v631_v13 = vmul.f32 %v912_v12, %v623_v10 }
 0x210   : > { %1026 = vmatpush3.bf16.msra.mxu0 %v1178_v4 }
 0x211   : > { %1027 = vmatprep.subr.bf16.mxu0 %v1375_v3  ;;  %v632_v15 = vpack.c.bf16 %v631_v13, %v631_v13 }
 0x214   : > { %1028 = vmatpush3.bf16.msra.mxu0 %v1179_v5 }
 0x215   : > { %1029 = vmatprep.subr.bf16.mxu0 %v1375_v3 }
 0x218   : > { %1030 = vmatpush3.bf16.msra.mxu0 %v1180_v6 }
 0x219   : > { %1031 = vmatprep.subr.bf16.mxu0 %v1375_v3 }
 0x21c   : > { %1032 = vmatpush3.bf16.msra.mxu0 %v1181_v7 }
 0x21d   : > { %1033 = vmatprep.subr.bf16.mxu0 %v1375_v3 }
 0x220   : > { %1034 = vmatpush3.bf16.msra.mxu0 %v1182_v8 }
 0x221   : > { %1035 = vmatprep.subr.bf16.mxu0 %v1375_v3 }
 0x224   : > { %1036 = vmatpush3.bf16.msra.mxu0 %v1183_v11 }
 0x225   : > { %1037 = vmatprep.subr.bf16.mxu0 %v1375_v3 }
 0x228   : > { %1038 = vmatpush3.bf16.msra.mxu0 %v1184_v14 }
 0x22b   : > { %1040 = vmatmul.mubr.bf16.vlgmr.msra.gmra.mxu0 %v632_v15 }
 0x2eb   : > { %v737_v17 = vpop.f32.mrf.mxu0 }
 0x2ec   : > { %v738_v18 = vadd.f32 %v913_v16, %v737_v17 }
 0x2ed   : > { %v1041_v19 = vpop.f32.mrf.mxu0 }
 0x2ee   : > { %743 = vst [vmem:[%s1552_s2] sm:$0xff] %v738_v18 }
 0x2ef   : > { %v740_v20 = vpop.f32.mrf.mxu0 }
 0x2f1   : > { %v1042_v21 = vpop.f32.mrf.mxu0 }
 0x2f2 PF: > { %s923_s15 = sshll.u32 %s1353_s16, 7  ;;  %s760_s27 = sshll.u32 %s1552_s2, 4  ;;  %s761_s27 = int_to_ptr.vmem [resolvable:$true] %s760_s27 }
 0x2f3   : > { %s758_s26 = scalar_lea.hbm %s1637_s3, %s923_s15  ;;  %s745_s9 = scalar_lea.sflag [#allocation6], %s1537_s28 }
 0x2f4   : > { %s1265_s10 = scalar_lea.vmem %s761_s27, 128  ;;  %s1377_s23 = smov [#allocation10]  }
 0x2f5   : > { %p1266_p12 = scmp.ne.s32.totalorder %s761_s27, %s1265_s10  ;;  %s1269_s11 = sshll.u32 %s1377_s23, 4  ;;  %s1270_s11 = int_to_ptr.vmem [resolvable:$false] %s1269_s11 }
 0x2f6   : > { %s1271_s20 = scalar_lea.vmem %s1270_s11, 256  ;;  %p1272_p0 = scmp.lt.s32.totalorder %s761_s27, %s1270_s11 }
 0x2f7   : > { %p1267_p13 = pnand %p1266_p12, %p1507_p5  ;;  %p1273_p1 = scmp.lt.s32.totalorder %s1271_s20, %s1265_s10 }
 0x2f9   : > { %p1268_p3 = pneg %p1267_p13  ;;  %p1274_p4 = por %p1273_p1, %p1272_p0 }
 0x2fb   : > { %p1275_p6 = pnand %p1274_p4, %p1268_p3 }
 0x2fd   : > { %1278 = shalt.err (!%p1275_p6)
}
 0x2fe   : > { %s1279_s16 = scalar_lea.hbm %s758_s26, 128  ;;  %s1283_s6 = scalar_lea.hbm %s1637_s3, 256 }
 0x2ff   : > { %p1280_p11 = scmp.ne.s32.totalorder %s758_s26, %s1279_s16  ;;  %p1284_p8 = scmp.lt.s32.totalorder %s758_s26, %s1637_s3 }
 0x300   : > { %p1285_p9 = scmp.lt.s32.totalorder %s1283_s6, %s1279_s16 }
 0x301   : > { %p1281_p10 = pnand %p1280_p11, %p1507_p5 }
 0x302   : > { %p1286_p2 = por %p1285_p9, %p1284_p8 }
 0x303   : > { %p1282_p7 = pneg %p1281_p10 }
 0x305   : > { %p1287_p12 = pnand %p1286_p2, %p1282_p7 }
 0x307   : > { %1290 = shalt.err (!%p1287_p12)
}
 0x308   : > { %1053 = dma.vmem_to_hbm [thread:$0]  (%p1507_p5), %s761_s27, 128, %s758_s26, %s745_s9  }
 0x309 PF: > { %p1075_p13 = scmp.ge.s32.totalorder %s1365_s19, 2  ;;  %s772_s4 = sand.u32 1, %s1337_s12  }
 0x30a   : > { %p1658_p3 = scmp.ne.s32.totalorder %s1647_s25, 0  ;;  %s773_s8 = scalar_lea.sflag [#allocation6], %s772_s4 }
 0x30c   : > { %p1067_p0 = pnand %p1075_p13, %p1658_p3 }
 0x30e   : > { %p1068_p1 = pneg %p1067_p0 }
 0x310   : > { %1332 = dma.done.wait (%p1068_p1), %s773_s8, 128  }
 0x311   : > { %1334 = vsyncadd (%p1068_p1), %s773_s8, 4294967168  ;;  %s20_s19 = sadd.s32 1, %s1365_s19   ;;  %s1659_s30 = sld [smem:[#allocation14_spill]] }
 0x312   : > { %p17_p4 = scmp.ge.s32.totalorder %s20_s19, 6   ;;  %s1660_s12 = smov %s1341_s13 }
 0x313   : > { %s1661_s13 = smov %s1345_s14  ;;  %s1662_s14 = smov %s1528_s1 }
 0x314   : > { %s1663_s15 = smov %s1357_s17  ;;  %s1664_s16 = smov %s1361_s18 }
 0x315   : > { %s1665_s17 = smov %s1668_s21  ;;  %19 = sbr.rel (!%p17_p4) target bundleno = 11 (0xb), region = 102 }
 0x317   : > { %s1666_s18 = smov %s1659_s30 }
 0x31a   :  { %778 = vsyncpa [#allocation5], 1 }
 0x31b   :  { %780 = vsyncpa [#allocation5 + $0x1], 1 }
 0x31c   :  { %781 = vsyncpa [#allocation8], 1 }
 0x31d   :  { %782 = vsyncpa [#allocation6], 1 }
 0x31e   :  { %784 = vsyncpa [#allocation6 + $0x1], 1 }

</bundles_post_ra>
